<compile_context>
chip_gen: v7x
topology: tpu7x:2x2x1
jax: 0.10.0
libtpu: 0.0.40
codegen_flags: <defaults>
</compile_context>

<pallas_src>
import math

import jax
import jax.numpy as jnp
from jax.experimental import pallas as pl
from jax.experimental.pallas import tpu as pltpu


def _ffn_kernel(x_ref, w13_ref, w2_ref, o_ref, acc_ref):
    """One (M-tile, hidden-tile) step of the SwiGLU feedforward.

    x_ref   : (tm, dim_pad)        input activations tile (native dtype)
    w13_ref : (dim_pad, 2*tn)      fused [w1^T | w3^T] hidden tile
    w2_ref  : (tn, dim_pad)        w2^T hidden tile
    o_ref   : (tm, dim_pad)        output tile (written on last hidden step)
    acc_ref : (tm, dim_pad) f32    VMEM accumulator across hidden tiles
    """
    j = pl.program_id(1)
    tn = w2_ref.shape[0]

    @pl.when(j == 0)
    def _init():
        acc_ref[...] = jnp.zeros_like(acc_ref)

    # Fused gate/up projection: one MXU matmul, f32 accumulation.
    gu = jnp.dot(x_ref[...], w13_ref[...], preferred_element_type=jnp.float32)
    gate = gu[:, :tn]
    up = gu[:, tn:]

    # SiLU(gate) * up in f32 (VPU + EUP), then back to the weight dtype for the
    # down-projection so the MXU runs at native (e.g. bf16) throughput.
    h = gate * jax.nn.sigmoid(gate) * up
    acc_ref[...] += jnp.dot(
        h.astype(w2_ref.dtype), w2_ref[...], preferred_element_type=jnp.float32
    )

    @pl.when(j == pl.num_programs(1) - 1)
    def _finalize():
        # Dropout at inference is identity (p only applied in training).
        o_ref[...] = acc_ref[...].astype(o_ref.dtype)


def feed_forward_pallas(x, w1, w2, w3, *, tm=256, tn=512):
    """Apply the SwiGLU FFN.

    x : (..., dim)
    w1: (hidden, dim)   PyTorch Linear weight layout
    w2: (dim, hidden)
    w3: (hidden, dim)
    """
    orig_shape = x.shape
    dim = orig_shape[-1]
    x2d = x.reshape(-1, dim)
    M = x2d.shape[0]
    hidden = w1.shape[0]
    out_dtype = x.dtype

    # Lane-dense model dim (multiple of 128); hidden tile is 128-aligned and
    # capped at the (padded) hidden size.
    dim_pad = 128 * pl.cdiv(dim, 128)
    tn = min(tn, 128 * pl.cdiv(hidden, 128))
    hidden_pad = tn * pl.cdiv(hidden, tn)
    grid_h = hidden_pad // tn

    # M tile: large by default for MXU row utilization; clamp to M when small.
    if M <= tm:
        tm = M
    grid_m = pl.cdiv(M, tm)

    # Weight prep (plain-JAX glue): transpose, zero-pad, fuse gate/up per tile.
    w1_t = w1.T  # (dim, hidden)
    w3_t = w3.T  # (dim, hidden)
    w2_t = w2.T  # (hidden, dim)
    if dim_pad != dim or hidden_pad != hidden:
        w1_t = jnp.pad(w1_t, ((0, dim_pad - dim), (0, hidden_pad - hidden)))
        w3_t = jnp.pad(w3_t, ((0, dim_pad - dim), (0, hidden_pad - hidden)))
        w2_t = jnp.pad(w2_t, ((0, hidden_pad - hidden), (0, dim_pad - dim)))
    if dim_pad != dim:
        x2d = jnp.pad(x2d, ((0, 0), (0, dim_pad - dim)))

    # Interleave so hidden-tile j is one contiguous (dim_pad, 2*tn) block:
    # [gate_tile_j | up_tile_j].
    w13 = jnp.concatenate(
        [w1_t.reshape(dim_pad, grid_h, tn), w3_t.reshape(dim_pad, grid_h, tn)],
        axis=-1,
    ).reshape(dim_pad, grid_h * 2 * tn)

    out = pl.pallas_call(
        _ffn_kernel,
        out_shape=jax.ShapeDtypeStruct((M, dim_pad), out_dtype),
        grid_spec=pltpu.PrefetchScalarGridSpec(
            num_scalar_prefetch=0,
            grid=(grid_m, grid_h),
            in_specs=[
                pl.BlockSpec((tm, dim_pad), lambda i, j: (i, 0)),      # x tile
                pl.BlockSpec((dim_pad, 2 * tn), lambda i, j: (0, j)),  # [w1|w3]^T tile
                pl.BlockSpec((tn, dim_pad), lambda i, j: (j, 0)),      # w2^T tile
            ],
            out_specs=pl.BlockSpec((tm, dim_pad), lambda i, j: (i, 0)),
            scratch_shapes=[pltpu.VMEM((tm, dim_pad), jnp.float32)],
        ),
        compiler_params=pltpu.CompilerParams(
            dimension_semantics=("parallel", "arbitrary"),
            vmem_limit_bytes=64 * 1024 * 1024,
        ),
    )(x2d, w13, w2_t)

    if dim_pad != dim:
        out = out[:, :dim]
    return out.reshape(orig_shape)


def _init_linear_weight(key, out_features, in_features, dtype=jnp.float32):
    # Deterministic init mimicking nn.Linear's kaiming-uniform default.
    bound = 1.0 / math.sqrt(in_features)
    return jax.random.uniform(
        key, (out_features, in_features), dtype=dtype, minval=-bound, maxval=bound
    )


def _reference_ffn(x, w1, w2, w3):
    # Pure-JAX reference matching the PyTorch forward (dropout = identity).
    x = x.astype(jnp.float32)
    gate = x @ w1.T.astype(jnp.float32)
    up = x @ w3.T.astype(jnp.float32)
    h = gate * jax.nn.sigmoid(gate) * up
    return h @ w2.T.astype(jnp.float32)


if __name__ == "__main__":
    # Module config: hidden_dim=None path -> hidden = multiple_of*ceil((2*4*dim/3)/multiple_of)
    dim = 64
    multiple_of = 32
    hidden_dim = 4 * dim
    hidden_dim = int(2 * hidden_dim / 3)
    hidden_dim = multiple_of * ((hidden_dim + multiple_of - 1) // multiple_of)  # 192
    dropout = 0.0  # inference: dropout is identity

    batch, seq = 2, 8

    key = jax.random.PRNGKey(0)
    kx, k1, k2, k3 = jax.random.split(key, 4)

    x = jax.random.normal(kx, (batch, seq, dim), dtype=jnp.float32)
    w1 = _init_linear_weight(k1, hidden_dim, dim)   # (hidden, dim)
    w2 = _init_linear_weight(k2, dim, hidden_dim)   # (dim, hidden)
    w3 = _init_linear_weight(k3, hidden_dim, dim)   # (hidden, dim)

    # f32 path
    out = feed_forward_pallas(x, w1, w2, w3)
    out = jax.block_until_ready(out)
    ref = _reference_ffn(x, w1, w2, w3)
    assert out.shape == ref.shape == (batch, seq, dim)
    assert jnp.allclose(out, ref, atol=1e-3, rtol=1e-3), "f32 mismatch vs reference"

    # bf16 path (native-dtype MXU operands); looser tolerance for quantization.
    xb, w1b, w2b, w3b = (a.astype(jnp.bfloat16) for a in (x, w1, w2, w3))
    out_b = jax.block_until_ready(feed_forward_pallas(xb, w1b, w2b, w3b))
    ref_b = _reference_ffn(xb, w1b, w2b, w3b)
    assert jnp.allclose(out_b.astype(jnp.float32), ref_b, atol=1e-1, rtol=1e-1), \
        "bf16 mismatch vs reference"

    print("KERNEL_OK")
</pallas_src>

<mosaic_0001>
module attributes {stable_mosaic.version = 11 : i64} {
  func.func @_ffn_kernel(%arg0: i32, %arg1: i32, %arg2: memref<16x128xf32, #tpu.memory_space<vmem>>, %arg3: memref<128x512xf32, #tpu.memory_space<vmem>>, %arg4: memref<256x128xf32, #tpu.memory_space<vmem>>, %arg5: memref<16x128xf32, #tpu.memory_space<vmem>>, %arg6: memref<16x128xf32, #tpu.memory_space<vmem>>) attributes {dimension_semantics = [#tpu.dimension_semantics<parallel>, #tpu.dimension_semantics<arbitrary>], iteration_bounds = array<i64: 1, 1>, scalar_prefetch = 0 : i64, scratch_operands = 1 : i64, tpu.core_type = #tpu.core_type<tc>, window_params = [{transform_indices = @transform_0, window_bounds = array<i64: 16, 128>}, {transform_indices = @transform_1, window_bounds = array<i64: 128, 512>}, {transform_indices = @transform_2, window_bounds = array<i64: 256, 128>}, {transform_indices = @transform_3, window_bounds = array<i64: 16, 128>}]} {
    %c0_i32 = arith.constant 0 : i32
    %0 = arith.cmpi eq, %arg1, %c0_i32 : i32
    %1 = arith.extui %0 : i1 to i32
    %c0_i32_0 = arith.constant 0 : i32
    %2 = arith.cmpi ne, %1, %c0_i32_0 : i32
    scf.if %2 {
      %cst_14 = arith.constant 0.000000e+00 : f32
      %23 = vector.broadcast %cst_14 : f32 to vector<16x128xf32>
      %c0_15 = arith.constant 0 : index
      %c0_16 = arith.constant 0 : index
      %24 = vector.load %arg6[%c0_15, %c0_16] : memref<16x128xf32, #tpu.memory_space<vmem>>, vector<16x128xf32>
      tpu.vector_store %arg6[%c0_15, %c0_16], %23 {strides = array<i32>} : memref<16x128xf32, #tpu.memory_space<vmem>>, vector<16x128xf32>,
    } else {
    }
    %c0 = arith.constant 0 : index
    %c0_1 = arith.constant 0 : index
    %3 = vector.load %arg2[%c0, %c0_1] : memref<16x128xf32, #tpu.memory_space<vmem>>, vector<16x128xf32>
    %c0_2 = arith.constant 0 : index
    %c0_3 = arith.constant 0 : index
    %4 = vector.load %arg3[%c0_2, %c0_3] : memref<128x512xf32, #tpu.memory_space<vmem>>, vector<128x512xf32>
    %cst = arith.constant dense<0.000000e+00> : vector<16x512xf32>
    %5 = tpu.matmul %3, %4, %cst {dimension_numbers = #tpu.dot_dimension_numbers<[1], [0], [0], [1], [0, 0, 1, 1], [], []>} : vector<16x128xf32>, vector<128x512xf32>, vector<16x512xf32> -> vector<16x512xf32>
    %6 = vector.extract_strided_slice %5 {offsets = [0, 0], sizes = [16, 256], strides = [1, 1]} : vector<16x512xf32> to vector<16x256xf32>
    %7 = vector.extract_strided_slice %5 {offsets = [0, 256], sizes = [16, 256], strides = [1, 1]} : vector<16x512xf32> to vector<16x256xf32>
    %8 = arith.negf %6 : vector<16x256xf32>
    %9 = math.exp %8 : vector<16x256xf32>
    %cst_4 = arith.constant 1.000000e+00 : f32
    %10 = vector.broadcast %cst_4 : f32 to vector<16x256xf32>
    %11 = arith.addf %10, %9 : vector<16x256xf32>
    %12 = arith.divf %10, %11 : vector<16x256xf32>
    %13 = arith.mulf %6, %12 : vector<16x256xf32>
    %14 = arith.mulf %13, %7 : vector<16x256xf32>
    %c0_5 = arith.constant 0 : index
    %c0_6 = arith.constant 0 : index
    %15 = vector.load %arg6[%c0_5, %c0_6] : memref<16x128xf32, #tpu.memory_space<vmem>>, vector<16x128xf32>
    %c0_7 = arith.constant 0 : index
    %c0_8 = arith.constant 0 : index
    %16 = vector.load %arg4[%c0_7, %c0_8] : memref<256x128xf32, #tpu.memory_space<vmem>>, vector<256x128xf32>
    %cst_9 = arith.constant dense<0.000000e+00> : vector<16x128xf32>
    %17 = tpu.matmul %14, %16, %cst_9 {dimension_numbers = #tpu.dot_dimension_numbers<[1], [0], [0], [1], [0, 0, 1, 1], [], []>} : vector<16x256xf32>, vector<256x128xf32>, vector<16x128xf32> -> vector<16x128xf32>
    %18 = arith.addf %15, %17 : vector<16x128xf32>
    %c0_10 = arith.constant 0 : index
    %c0_11 = arith.constant 0 : index
    %19 = vector.load %arg6[%c0_10, %c0_11] : memref<16x128xf32, #tpu.memory_space<vmem>>, vector<16x128xf32>
    tpu.vector_store %arg6[%c0_10, %c0_11], %18 {strides = array<i32>} : memref<16x128xf32, #tpu.memory_space<vmem>>, vector<16x128xf32>,
    %c0_i32_12 = arith.constant 0 : i32
    %20 = arith.cmpi eq, %arg1, %c0_i32_12 : i32
    %21 = arith.extui %20 : i1 to i32
    %c0_i32_13 = arith.constant 0 : i32
    %22 = arith.cmpi ne, %21, %c0_i32_13 : i32
    scf.if %22 {
      %c0_14 = arith.constant 0 : index
      %c0_15 = arith.constant 0 : index
      %23 = vector.load %arg6[%c0_14, %c0_15] : memref<16x128xf32, #tpu.memory_space<vmem>>, vector<16x128xf32>
      %c0_16 = arith.constant 0 : index
      %c0_17 = arith.constant 0 : index
      %24 = vector.load %arg5[%c0_16, %c0_17] : memref<16x128xf32, #tpu.memory_space<vmem>>, vector<16x128xf32>
      tpu.vector_store %arg5[%c0_16, %c0_17], %23 {strides = array<i32>} : memref<16x128xf32, #tpu.memory_space<vmem>>, vector<16x128xf32>,
    } else {
    }
    return
  }
  func.func @transform_0(%arg0: i32, %arg1: i32) -> (i32, i32) {
    %c0_i32 = arith.constant 0 : i32
    %c0_i32_0 = arith.constant 0 : i32
    return %arg0, %c0_i32 : i32, i32
  }
  func.func @transform_1(%arg0: i32, %arg1: i32) -> (i32, i32) {
    %c0_i32 = arith.constant 0 : i32
    %c0_i32_0 = arith.constant 0 : i32
    return %c0_i32, %arg1 : i32, i32
  }
  func.func @transform_2(%arg0: i32, %arg1: i32) -> (i32, i32) {
    %c0_i32 = arith.constant 0 : i32
    %c0_i32_0 = arith.constant 0 : i32
    return %arg1, %c0_i32 : i32, i32
  }
  func.func @transform_3(%arg0: i32, %arg1: i32) -> (i32, i32) {
    %c0_i32 = arith.constant 0 : i32
    %c0_i32_0 = arith.constant 0 : i32
    return %arg0, %c0_i32 : i32, i32
  }
}

</mosaic_0001>

<bundles_post_ra>
// kernel: tpu_custom_call.1
= control target key start
LH: loop header
LB: loop body
LE: loop exit
PB: predicated region body
PF: predicated region fallthrough
CT: control target
= control target key end

     0   :  { %8 = vsyncpa [#allocation4], 0  ;;  %s815_s0 = inlined_call_operand.hbm [shape: f32[16,128], index: 0, kind: input, shape index: {}]   ;;  %s816_s1 = inlined_call_operand.hbm [shape: f32[128,512], index: 1, kind: input, shape index: {}]   ;;  %s817_s2 = inlined_call_operand.hbm [shape: f32[256,128], index: 2, kind: input, shape index: {}]   ;;  %s818_s3 = inlined_call_operand.hbm [shape: f32[16,128], index: 3, kind: output, shape index: {}]  }
   0x1   :  { %9 = vsyncpa [#allocation7], 0 }
   0x2   :  { %10 = vsyncpa [#allocation5], 0  ;;  %s725_s12 = smov [#allocation6]   ;;  %s631_s16 = scalar_lea.hbm %s816_s1, 8192 }
   0x3   :  { %s28_s13 = sshll.u32 %s725_s12, 4  ;;  %p632_p0 = scmp.ne.s32.totalorder %s816_s1, %s631_s16  ;;  %s29_s13 = int_to_ptr.vmem [resolvable:$true] %s28_s13 }
   0x4   :  { %p635_p1 = scmp.lt.u32.totalorder %s631_s16, %s816_s1 }
   0x6   :  { %p637_p2 = pnand %p635_p1, %p632_p0 }
   0x8   :  { %640 = shalt.err (!%p637_p2)
}
   0x9   :  { %s641_s21 = scalar_lea.vmem %s29_s13, 8192  ;;  %p646_p4 = scmp.lt.s32.totalorder %s29_s13, %s29_s13 }
   0xa   :  { %p642_p3 = scmp.ne.s32.totalorder %s29_s13, %s641_s21  ;;  %p647_p5 = scmp.lt.s32.totalorder %s641_s21, %s641_s21 }
   0xc   :  { %p648_p6 = por %p647_p5, %p646_p4 }
   0xe   :  { %p649_p7 = pnand %p648_p6, %p642_p3 }
  0x10   :  { %652 = shalt.err (!%p649_p7)
}
  0x11   :  { %s726_s22 = smov 512   ;;  %s727_s23 = smov 32  }
  0x12   :  { %34 = dma.hbm_to_vmem [thread:$0]  %s816_s1, 8192, %s29_s13, [#allocation7], %s726_s22, %s726_s22, %s727_s23  }
  0x13   :  { %s728_s26 = smov [#allocation3]   ;;  %s653_s30 = scalar_lea.hbm %s815_s0, 256 }
  0x14   :  { %s16_s27 = sshll.u32 %s728_s26, 4  ;;  %p654_p8 = scmp.ne.s32.totalorder %s815_s0, %s653_s30  ;;  %s17_s27 = int_to_ptr.vmem [resolvable:$true] %s16_s27 }
  0x15   :  { %p657_p9 = scmp.lt.u32.totalorder %s653_s30, %s815_s0 }
  0x17   :  { %p659_p10 = pnand %p657_p9, %p654_p8 }
  0x19   :  { %662 = shalt.err (!%p659_p10)
}
  0x1a   :  { %s663_s8 = scalar_lea.vmem %s17_s27, 256  ;;  %p668_p12 = scmp.lt.s32.totalorder %s17_s27, %s17_s27 }
  0x1b   :  { %p664_p11 = scmp.ne.s32.totalorder %s17_s27, %s663_s8  ;;  %p669_p13 = scmp.lt.s32.totalorder %s663_s8, %s663_s8 }
  0x1d   :  { %p670_p0 = por %p669_p13, %p668_p12 }
  0x1f   :  { %p671_p1 = pnand %p670_p0, %p664_p11 }
  0x21   :  { %674 = shalt.err (!%p671_p1)
}
  0x22   :  { %s729_s1 = smov 128   ;;  %s730_s9 = smov 8  }
  0x23   :  { %22 = dma.hbm_to_vmem [thread:$0]  %s815_s0, 256, %s17_s27, [#allocation4], %s729_s1, %s729_s1, %s730_s9  }
  0x24   :  { %s731_s12 = smov [#allocation8]   ;;  %s675_s16 = scalar_lea.hbm %s817_s2, 4096 }
  0x25   :  { %s40_s13 = sshll.u32 %s731_s12, 4  ;;  %p676_p2 = scmp.ne.s32.totalorder %s817_s2, %s675_s16  ;;  %s41_s13 = int_to_ptr.vmem [resolvable:$true] %s40_s13 }
  0x26   :  { %p679_p3 = scmp.lt.u32.totalorder %s675_s16, %s817_s2 }
  0x28   :  { %p681_p4 = pnand %p679_p3, %p676_p2 }
  0x2a   :  { %684 = shalt.err (!%p681_p4)
}
  0x2b   :  { %s685_s21 = scalar_lea.vmem %s41_s13, 4096  ;;  %p690_p6 = scmp.lt.s32.totalorder %s41_s13, %s41_s13 }
  0x2c   :  { %p686_p5 = scmp.ne.s32.totalorder %s41_s13, %s685_s21  ;;  %p691_p7 = scmp.lt.s32.totalorder %s685_s21, %s685_s21 }
  0x2e   :  { %p692_p8 = por %p691_p7, %p690_p6 }
  0x30   :  { %p693_p9 = pnand %p692_p8, %p686_p5 }
  0x32   :  { %696 = shalt.err (!%p693_p9)
}
  0x33   :  { %46 = dma.hbm_to_vmem [thread:$0]  %s817_s2, 4096, %s41_s13, [#allocation7], %s729_s1, %s729_s1, %s730_s9  }
  0x34   :  { %719 = dma.done.wait [#allocation4], 256  }
  0x35   :  { %720 = vsyncadd [#allocation4], 4294967040 }
  0x36   :  { %721 = dma.done.wait [#allocation7], 12288  }
  0x37   :  { %722 = vsyncadd [#allocation7], 4294955008  ;;  %v732_v0 = vmov 0.0   ;;  %v65_v1 = vld [vmem:[#allocation6 + $0x8] sm:$0xff]  ;;  %v64_v3 = vld [vmem:[#allocation6] sm:$0xff]  ;;  %s733_s2 = smov [#allocation9]  }
  0x38   :  { %192 = vmatprep.mubr.f32.mxu0 %v732_v0  ;;  %269 = vmatprep.mubr.f32.mxu1 %v732_v0  ;;  %v69_v2 = vld [vmem:[#allocation6 + $0x28] sm:$0xff]  ;;  %v68_v5 = vld [vmem:[#allocation6 + $0x20] sm:$0xff]  ;;  %v67_v24 = vld [vmem:[#allocation6 + $0x18] sm:$0xff]  ;;  %s439_s23 = sshll.u32 %s733_s2, 4  ;;  %s440_s23 = int_to_ptr.vmem [resolvable:$true] %s439_s23 }
  0x39   :  { %v494_v4 = vpack.c.bf16 %v69_v2, %v65_v1  ;;  %v73_v6 = vld [vmem:[#allocation6 + $0x48] sm:$0xff]  ;;  %v496_v8 = vpack.c.bf16 %v68_v5, %v64_v3  ;;  %v72_v10 = vld [vmem:[#allocation6 + $0x40] sm:$0xff]  ;;  %v71_v25 = vld [vmem:[#allocation6 + $0x38] sm:$0xff]  ;;  %s697_s24 = scalar_lea.vmem %s440_s23, 256  ;;  %p702_p11 = scmp.lt.s32.totalorder %s440_s23, %s440_s23 }
  0x3a   :  { %v77_v7 = vld [vmem:[#allocation6 + $0x68] sm:$0xff]  ;;  %v76_v11 = vld [vmem:[#allocation6 + $0x60] sm:$0xff]  ;;  %v526_v28 = vpack.c.bf16 %v71_v25, %v67_v24  ;;  %v66_v29 = vld [vmem:[#allocation6 + $0x10] sm:$0xff]  ;;  %p698_p10 = scmp.ne.s32.totalorder %s440_s23, %s697_s24  ;;  %p703_p12 = scmp.lt.s32.totalorder %s697_s24, %s697_s24 }
  0x3b   :  { %v498_v9 = vpack.c.bf16 %v77_v7, %v73_v6  ;;  %v81_v12 = vld [vmem:[#allocation6 + $0x88] sm:$0xff]  ;;  %495 = vmatprep.subr.bf16.mxu0 %v494_v4  ;;  %v500_v14 = vpack.c.bf16 %v76_v11, %v72_v10  ;;  %v80_v16 = vld [vmem:[#allocation6 + $0x80] sm:$0xff]  ;;  %v70_v31 = vld [vmem:[#allocation6 + $0x30] sm:$0xff] }
  0x3c   :  { %v85_v13 = vld [vmem:[#allocation6 + $0xa8] sm:$0xff]  ;;  %497 = vmatpush1.bf16.msra.mxu0 %v496_v8  ;;  %v84_v17 = vld [vmem:[#allocation6 + $0xa0] sm:$0xff]  ;;  %527 = vmatprep.subr.bf16.mxu1 %v526_v28  ;;  %v528_v34 = vpack.c.bf16 %v70_v31, %v66_v29  ;;  %v75_v35 = vld [vmem:[#allocation6 + $0x58] sm:$0xff]  ;;  %p704_p13 = por %p703_p12, %p702_p11 }
  0x3d   :  { %499 = vmatprep.subr.bf16.mxu0 %v498_v9  ;;  %v502_v15 = vpack.c.bf16 %v85_v13, %v81_v12  ;;  %v89_v18 = vld [vmem:[#allocation6 + $0xc8] sm:$0xff]  ;;  %v504_v20 = vpack.c.bf16 %v84_v17, %v80_v16  ;;  %v88_v21 = vld [vmem:[#allocation6 + $0xc0] sm:$0xff]  ;;  %v79_v36 = vld [vmem:[#allocation6 + $0x78] sm:$0xff] }
  0x3e   :  { %v93_v19 = vld [vmem:[#allocation6 + $0xe8] sm:$0xff]  ;;  %v92_v23 = vld [vmem:[#allocation6 + $0xe0] sm:$0xff]  ;;  %v530_v38 = vpack.c.bf16 %v79_v36, %v75_v35  ;;  %v74_v39 = vld [vmem:[#allocation6 + $0x50] sm:$0xff]  ;;  %529 = vmatpush1.bf16.msra.mxu1 %v528_v34  ;;  %p705_p0 = pnand %p704_p13, %p698_p10 }
  0x3f   :  { %v506_v22 = vpack.c.bf16 %v93_v19, %v89_v18  ;;  %v97_v26 = vld [vmem:[#allocation6 + $0x108] sm:$0xff]  ;;  %v96_v30 = vld [vmem:[#allocation6 + $0x100] sm:$0xff]  ;;  %v508_v32 = vpack.c.bf16 %v92_v23, %v88_v21  ;;  %v78_v40 = vld [vmem:[#allocation6 + $0x70] sm:$0xff] }
  0x40   :  { %501 = vmatpush1.bf16.msra.mxu0 %v500_v14  ;;  %v101_v27 = vld [vmem:[#allocation6 + $0x128] sm:$0xff]  ;;  %v100_v33 = vld [vmem:[#allocation6 + $0x120] sm:$0xff]  ;;  %v83_v41 = vld [vmem:[#allocation6 + $0x98] sm:$0xff]  ;;  %v532_v44 = vpack.c.bf16 %v78_v40, %v74_v39  ;;  %531 = vmatprep.subr.bf16.mxu1 %v530_v38 }
  0x41   :  { %503 = vmatprep.subr.bf16.mxu0 %v502_v15  ;;  %v510_v37 = vpack.c.bf16 %v101_v27, %v97_v26  ;;  %v105_v42 = vld [vmem:[#allocation6 + $0x148] sm:$0xff]  ;;  %v87_v45 = vld [vmem:[#allocation6 + $0xb8] sm:$0xff]  ;;  %v82_v47 = vld [vmem:[#allocation6 + $0x90] sm:$0xff]  ;;  %v512_v49 = vpack.c.bf16 %v100_v33, %v96_v30 }
  0x42   :  { %v109_v43 = vld [vmem:[#allocation6 + $0x168] sm:$0xff]  ;;  %v534_v46 = vpack.c.bf16 %v87_v45, %v83_v41  ;;  %v86_v48 = vld [vmem:[#allocation6 + $0xb0] sm:$0xff]  ;;  %v91_v50 = vld [vmem:[#allocation6 + $0xd8] sm:$0xff]  ;;  %533 = vmatpush1.bf16.msra.mxu1 %v532_v44 }
  0x43   :  { %v95_v51 = vld [vmem:[#allocation6 + $0xf8] sm:$0xff]  ;;  %v514_v52 = vpack.c.bf16 %v109_v43, %v105_v42  ;;  %v104_v53 = vld [vmem:[#allocation6 + $0x140] sm:$0xff]  ;;  %v113_v55 = vld [vmem:[#allocation6 + $0x188] sm:$0xff]  ;;  %v536_v57 = vpack.c.bf16 %v86_v48, %v82_v47 }
  0x44   :  { %505 = vmatpush1.bf16.msra.mxu0 %v504_v20  ;;  %v108_v54 = vld [vmem:[#allocation6 + $0x160] sm:$0xff]  ;;  %v117_v56 = vld [vmem:[#allocation6 + $0x1a8] sm:$0xff]  ;;  %535 = vmatprep.subr.bf16.mxu1 %v534_v46  ;;  %v538_v58 = vpack.c.bf16 %v95_v51, %v91_v50  ;;  %v90_v59 = vld [vmem:[#allocation6 + $0xd0] sm:$0xff] }
  0x45   :  { %507 = vmatprep.subr.bf16.mxu0 %v506_v22  ;;  %v94_v60 = vld [vmem:[#allocation6 + $0xf0] sm:$0xff]  ;;  %v516_v61 = vpack.c.bf16 %v108_v54, %v104_v53  ;;  %v99_v62 = vld [vmem:[#allocation6 + $0x118] sm:$0xff]  ;;  %v518_v1 = vpack.c.bf16 %v117_v56, %v113_v55  ;;  %v112_v2 = vld [vmem:[#allocation6 + $0x180] sm:$0xff] }
  0x46   :  { %v103_v63 = vld [vmem:[#allocation6 + $0x138] sm:$0xff]  ;;  %v116_v3 = vld [vmem:[#allocation6 + $0x1a0] sm:$0xff]  ;;  %v121_v4 = vld [vmem:[#allocation6 + $0x1c8] sm:$0xff]  ;;  %537 = vmatpush1.bf16.msra.mxu1 %v536_v57  ;;  %v540_v6 = vpack.c.bf16 %v94_v60, %v90_v59 }
  0x47   :  { %v125_v5 = vld [vmem:[#allocation6 + $0x1e8] sm:$0xff]  ;;  %539 = vmatprep.subr.bf16.mxu1 %v538_v58  ;;  %v542_v7 = vpack.c.bf16 %v103_v63, %v99_v62  ;;  %v98_v8 = vld [vmem:[#allocation6 + $0x110] sm:$0xff]  ;;  %v520_v10 = vpack.c.bf16 %v116_v3, %v112_v2  ;;  %v107_v11 = vld [vmem:[#allocation6 + $0x158] sm:$0xff] }
  0x48   :  { %509 = vmatpush1.bf16.msra.mxu0 %v508_v32  ;;  %v102_v9 = vld [vmem:[#allocation6 + $0x130] sm:$0xff]  ;;  %v111_v12 = vld [vmem:[#allocation6 + $0x178] sm:$0xff]  ;;  %v522_v13 = vpack.c.bf16 %v125_v5, %v121_v4  ;;  %v120_v14 = vld [vmem:[#allocation6 + $0x1c0] sm:$0xff] }
  0x49   :  { %511 = vmatprep.subr.bf16.mxu0 %v510_v37  ;;  %v124_v15 = vld [vmem:[#allocation6 + $0x1e0] sm:$0xff]  ;;  %v544_v16 = vpack.c.bf16 %v102_v9, %v98_v8  ;;  %v546_v17 = vpack.c.bf16 %v111_v12, %v107_v11  ;;  %v106_v18 = vld [vmem:[#allocation6 + $0x150] sm:$0xff]  ;;  %v115_v21 = vld [vmem:[#allocation6 + $0x198] sm:$0xff] }
  0x4a   :  { %541 = vmatpush1.bf16.msra.mxu1 %v540_v6  ;;  %v110_v19 = vld [vmem:[#allocation6 + $0x170] sm:$0xff]  ;;  %v524_v20 = vpack.c.bf16 %v124_v15, %v120_v14  ;;  %v119_v22 = vld [vmem:[#allocation6 + $0x1b8] sm:$0xff]  ;;  %v332_v36 = vld [vmem:[#allocation8 + $0x80] sm:$0xff] }
  0x4b   :  { %543 = vmatprep.subr.bf16.mxu1 %v542_v7  ;;  %v548_v23 = vpack.c.bf16 %v110_v19, %v106_v18  ;;  %v550_v24 = vpack.c.bf16 %v119_v22, %v115_v21  ;;  %v114_v25 = vld [vmem:[#allocation6 + $0x190] sm:$0xff]  ;;  %v123_v28 = vld [vmem:[#allocation6 + $0x1d8] sm:$0xff]  ;;  %v333_v37 = vld [vmem:[#allocation8 + $0x88] sm:$0xff] }
  0x4c   :  { %513 = vmatpush1.bf16.msra.mxu0 %v512_v49  ;;  %v118_v26 = vld [vmem:[#allocation6 + $0x1b0] sm:$0xff]  ;;  %v127_v29 = vld [vmem:[#allocation6 + $0x1f8] sm:$0xff]  ;;  %v558_v38 = vpack.c.bf16 %v333_v37, %v332_v36  ;;  %v316_v39 = vld [vmem:[#allocation8] sm:$0xff] }
  0x4d   :  { %515 = vmatprep.subr.bf16.mxu0 %v514_v52  ;;  %v62_v27 = vld [vmem:[#allocation3] sm:$0xff]  ;;  %v552_v30 = vpack.c.bf16 %v118_v26, %v114_v25  ;;  %v554_v31 = vpack.c.bf16 %v127_v29, %v123_v28  ;;  %v63_v34 = vld [vmem:[#allocation3 + $0x8] sm:$0xff]  ;;  %v317_v40 = vld [vmem:[#allocation8 + $0x8] sm:$0xff] }
  0x4e   :  { %545 = vmatpush1.bf16.msra.mxu1 %v544_v16  ;;  %v122_v32 = vld [vmem:[#allocation6 + $0x1d0] sm:$0xff]  ;;  %v560_v41 = vpack.c.bf16 %v317_v40, %v316_v39  ;;  %v335_v43 = vld [vmem:[#allocation8 + $0x98] sm:$0xff]  ;;  %v337_v48 = vld [vmem:[#allocation8 + $0xa8] sm:$0xff] }
  0x4f   :  { %547 = vmatprep.subr.bf16.mxu1 %v546_v17  ;;  %v126_v33 = vld [vmem:[#allocation6 + $0x1f0] sm:$0xff]  ;;  %v319_v46 = vld [vmem:[#allocation8 + $0x18] sm:$0xff]  ;;  %v320_v50 = vld [vmem:[#allocation8 + $0x20] sm:$0xff] }
  0x50   :  { %517 = vmatpush1.bf16.msra.mxu0 %v516_v61  ;;  %v556_v35 = vpack.c.bf16 %v126_v33, %v122_v32  ;;  %v334_v42 = vld [vmem:[#allocation8 + $0x90] sm:$0xff]  ;;  %v321_v51 = vld [vmem:[#allocation8 + $0x28] sm:$0xff]  ;;  %v339_v54 = vld [vmem:[#allocation8 + $0xb8] sm:$0xff] }
  0x51   :  { %519 = vmatprep.subr.bf16.mxu0 %v518_v1  ;;  %v562_v44 = vpack.c.bf16 %v335_v43, %v334_v42  ;;  %v318_v45 = vld [vmem:[#allocation8 + $0x10] sm:$0xff]  ;;  %v568_v52 = vpack.c.bf16 %v321_v51, %v320_v50  ;;  %v323_v57 = vld [vmem:[#allocation8 + $0x38] sm:$0xff]  ;;  %v340_v59 = vld [vmem:[#allocation8 + $0xc0] sm:$0xff] }
  0x52   :  { %549 = vmatpush1.bf16.msra.mxu1 %v548_v23  ;;  %v564_v47 = vpack.c.bf16 %v319_v46, %v318_v45  ;;  %v338_v53 = vld [vmem:[#allocation8 + $0xb0] sm:$0xff]  ;;  %v341_v60 = vld [vmem:[#allocation8 + $0xc8] sm:$0xff]  ;;  %v324_v62 = vld [vmem:[#allocation8 + $0x40] sm:$0xff] }
  0x53   :  { %551 = vmatprep.subr.bf16.mxu1 %v550_v24  ;;  %v570_v55 = vpack.c.bf16 %v339_v54, %v338_v53  ;;  %v322_v56 = vld [vmem:[#allocation8 + $0x30] sm:$0xff]  ;;  %v574_v61 = vpack.c.bf16 %v341_v60, %v340_v59  ;;  %v325_v63 = vld [vmem:[#allocation8 + $0x48] sm:$0xff]  ;;  %v343_v3 = vld [vmem:[#allocation8 + $0xd8] sm:$0xff] }
  0x54   :  { %521 = vmatpush1.bf16.msra.mxu0 %v520_v10  ;;  %v572_v58 = vpack.c.bf16 %v323_v57, %v322_v56  ;;  %v576_v1 = vpack.c.bf16 %v325_v63, %v324_v62  ;;  %v342_v2 = vld [vmem:[#allocation8 + $0xd0] sm:$0xff]  ;;  %v327_v6 = vld [vmem:[#allocation8 + $0x58] sm:$0xff]  ;;  %v344_v8 = vld [vmem:[#allocation8 + $0xe0] sm:$0xff] }
  0x55   :  { %523 = vmatprep.subr.bf16.mxu0 %v522_v13  ;;  %v578_v4 = vpack.c.bf16 %v343_v3, %v342_v2  ;;  %v326_v5 = vld [vmem:[#allocation8 + $0x50] sm:$0xff]  ;;  %v345_v9 = vld [vmem:[#allocation8 + $0xe8] sm:$0xff]  ;;  %v328_v11 = vld [vmem:[#allocation8 + $0x60] sm:$0xff] }
  0x56   :  { %553 = vmatpush1.bf16.msra.mxu1 %v552_v30  ;;  %v580_v7 = vpack.c.bf16 %v327_v6, %v326_v5  ;;  %v582_v10 = vpack.c.bf16 %v345_v9, %v344_v8  ;;  %v329_v12 = vld [vmem:[#allocation8 + $0x68] sm:$0xff]  ;;  %v346_v14 = vld [vmem:[#allocation8 + $0xf0] sm:$0xff]  ;;  %v347_v15 = vld [vmem:[#allocation8 + $0xf8] sm:$0xff] }
  0x57   :  { %555 = vmatprep.subr.bf16.mxu1 %v554_v31  ;;  %v584_v13 = vpack.c.bf16 %v329_v12, %v328_v11  ;;  %v586_v16 = vpack.c.bf16 %v347_v15, %v346_v14  ;;  %v330_v17 = vld [vmem:[#allocation8 + $0x70] sm:$0xff]  ;;  %v331_v18 = vld [vmem:[#allocation8 + $0x78] sm:$0xff] }
  0x58   :  { %525 = vmatpush1.bf16.msra.mxu0 %v524_v20  ;;  %v588_v19 = vpack.c.bf16 %v331_v18, %v330_v17 }
  0x59   :  { %559 = vmatprep.subr.bf16.mxu0 %v558_v38 }
  0x5a   :  { %557 = vmatpush1.bf16.msra.mxu1 %v556_v35 }
  0x5b   :  { %193 = vmatmul.mubr.f32.vlgmr.msra.gmra.mrb[0].mxu0 %v62_v27  ;;  %590 = vmatprep.subr.bf16.mxu1 %v558_v38 }
  0x5c   :  { %198 = vmatprep.mubr.f32.mxu0 %v732_v0  ;;  %561 = vmatpush3.bf16.msra.mxu0 %v560_v41 }
  0x5d   :  { %270 = vmatmul.mubr.f32.vlgmr.msra.gmra.mrb[0].mxu1 %v62_v27  ;;  %563 = vmatprep.subr.bf16.mxu0 %v562_v44 }
  0x5e   :  { %275 = vmatprep.mubr.f32.mxu1 %v732_v0  ;;  %598 = vmatpush3.bf16.msra.mxu1 %v560_v41  ;;  %v336_v0 = vld [vmem:[#allocation8 + $0xa0] sm:$0xff] }
  0x5f   :  { %199 = vmatmul.mubr.f32.gmra.mrb[2].mxu0 %v63_v34  ;;  %591 = vmatprep.subr.bf16.mxu1 %v562_v44  ;;  %v566_v49 = vpack.c.bf16 %v337_v48, %v336_v0 }
  0x60   :  { %565 = vmatpush3.bf16.msra.mxu0 %v564_v47 }
  0x61   :  { %276 = vmatmul.mubr.f32.gmra.mrb[2].mxu1 %v63_v34  ;;  %567 = vmatprep.subr.bf16.mxu0 %v566_v49 }
  0x62   :  { %599 = vmatpush3.bf16.msra.mxu1 %v564_v47 }
  0x63   :  { %592 = vmatprep.subr.bf16.mxu1 %v566_v49 }
  0x64   :  { %569 = vmatpush3.bf16.msra.mxu0 %v568_v52 }
  0x65   :  { %571 = vmatprep.subr.bf16.mxu0 %v570_v55 }
  0x66   :  { %600 = vmatpush3.bf16.msra.mxu1 %v568_v52 }
  0x67   :  { %593 = vmatprep.subr.bf16.mxu1 %v570_v55 }
  0x68   :  { %573 = vmatpush3.bf16.msra.mxu0 %v572_v58 }
  0x69   :  { %575 = vmatprep.subr.bf16.mxu0 %v574_v61 }
  0x6a   :  { %601 = vmatpush3.bf16.msra.mxu1 %v572_v58 }
  0x6b   :  { %594 = vmatprep.subr.bf16.mxu1 %v574_v61 }
  0x6c   :  { %577 = vmatpush3.bf16.msra.mxu0 %v576_v1 }
  0x6d   :  { %579 = vmatprep.subr.bf16.mxu0 %v578_v4 }
  0x6e   :  { %602 = vmatpush3.bf16.msra.mxu1 %v576_v1 }
  0x6f   :  { %595 = vmatprep.subr.bf16.mxu1 %v578_v4 }
  0x70   :  { %581 = vmatpush3.bf16.msra.mxu0 %v580_v7 }
  0x71   :  { %583 = vmatprep.subr.bf16.mxu0 %v582_v10 }
  0x72   :  { %603 = vmatpush3.bf16.msra.mxu1 %v580_v7 }
  0x73   :  { %596 = vmatprep.subr.bf16.mxu1 %v582_v10 }
  0x74   :  { %585 = vmatpush3.bf16.msra.mxu0 %v584_v13 }
  0x75   :  { %587 = vmatprep.subr.bf16.mxu0 %v586_v16 }
  0x76   :  { %604 = vmatpush3.bf16.msra.mxu1 %v584_v13 }
  0x77   :  { %597 = vmatprep.subr.bf16.mxu1 %v586_v16 }
  0x78   :  { %589 = vmatpush3.bf16.msra.mxu0 %v588_v19 }
  0x7a   :  { %605 = vmatpush3.bf16.msra.mxu1 %v588_v19 }
 0x12e   :  { %v194_v20 = vpop.f32.mrb[0].mxu0 }
 0x12f   :  { %v452_v21 = vmul.f32 -1.442695, %v194_v20  ;;  %v196_v22 = vpop.f32.mrb[1].mxu0 }
 0x130   :  { %v453_v23 = vmul.f32 -1.442695, %v196_v22  ;;  %v271_v28 = vpop.f32.mrb[0].mxu1 }
 0x131   :  { %615 = vpow2.f32 %v452_v21  ;;  %v273_v29 = vpop.f32.mrb[1].mxu1 }
 0x132   :  { %617 = vpow2.f32 %v453_v23  ;;  %v200_v24 = vpop.f32.mrb[2].mxu0 }
 0x133   :  { %v454_v25 = vmul.f32 -1.442695, %v200_v24  ;;  %v202_v26 = vpop.f32.mrb[3].mxu0 }
 0x134   :  { %v455_v27 = vmul.f32 -1.442695, %v202_v26  ;;  %v277_v33 = vpop.f32.mrb[2].mxu1 }
 0x135   :  { %619 = vpow2.f32 %v454_v25  ;;  %v279_v35 = vpop.f32.mrb[3].mxu1 }
 0x136   :  { %621 = vpow2.f32 %v455_v27 }
 0x13b   :  { %v616_v30 = vpop.eup %615 }
 0x13c   :  { %v618_v31 = vpop.eup %617  ;;  %v294_v32 = vadd.f32 1.0, %v616_v30 }
 0x13d   :  { %v295_v34 = vadd.f32 1.0, %v618_v31 }
 0x13e   :  { %623 = vrcp.f32 %v294_v32 }
 0x13f   :  { %v620_v36 = vpop.eup %619  ;;  %625 = vrcp.f32 %v295_v34 }
 0x140   :  { %v622_v37 = vpop.eup %621  ;;  %v296_v38 = vadd.f32 1.0, %v620_v36 }
 0x141   :  { %v297_v39 = vadd.f32 1.0, %v622_v37 }
 0x142   :  { %627 = vrcp.f32 %v296_v38 }
 0x143   :  { %629 = vrcp.f32 %v297_v39 }
 0x148   :  { %v624_v40 = vpop.eup %623 }
 0x149   :  { %v626_v41 = vpop.eup %625  ;;  %v306_v42 = vmul.f32 %v624_v40, %v194_v20 }
 0x14a   :  { %v307_v43 = vmul.f32 %v626_v41, %v196_v22 }
 0x14b   :  { %v310_v44 = vmul.f32 %v306_v42, %v271_v28 }
 0x14c   :  { %v628_v45 = vpop.eup %627  ;;  %v311_v46 = vmul.f32 %v307_v43, %v273_v29 }
 0x14d   :  { %v630_v47 = vpop.eup %629  ;;  %v308_v0 = vmul.f32 %v628_v45, %v200_v24 }
 0x14e   :  { %v309_v48 = vmul.f32 %v630_v47, %v202_v26  ;;  %412 = vmatprep.mubr.f32.mxu0 %v311_v46 }
 0x14f   :  { %v312_v49 = vmul.f32 %v308_v0, %v277_v33  ;;  %413 = vmatmul.mubr.f32.vlgmr.msra.gmra.mrb[4].mxu0 %v310_v44 }
 0x150   :  { %v313_v50 = vmul.f32 %v309_v48, %v279_v35 }
 0x152   :  { %417 = vmatprep.mubr.f32.mxu1 %v313_v50 }
 0x153   :  { %418 = vmatmul.mubr.f32.vlgmr.msra.gmra.mrb[4].mxu1 %v312_v49 }
 0x222   :  { %v488_v51 = vpop.f32.mrb[4].mxu0 }
 0x223   :  { %v489_v52 = vpop.f32.mrb[5].mxu0 }
 0x224   :  { %v490_v53 = vadd.f32 %v489_v52, %v488_v51 }
 0x226   :  { %432 = vst [vmem:[#allocation9] sm:$0xff] %v490_v53  ;;  %v491_v54 = vpop.f32.mrb[4].mxu1 }
 0x227   :  { %v492_v55 = vpop.f32.mrb[5].mxu1 }
 0x228   :  { %v493_v56 = vadd.f32 %v492_v55, %v491_v54 }
 0x22a   :  { %433 = vst [vmem:[#allocation9 + $0x8] sm:$0xff] %v493_v56 }
 0x22b   :  { %708 = shalt.err (!%p705_p0)
}
 0x22c   :  { %s709_s27 = scalar_lea.hbm %s818_s3, 256 }
 0x22d   :  { %p710_p1 = scmp.ne.s32.totalorder %s818_s3, %s709_s27  ;;  %p713_p2 = scmp.lt.u32.totalorder %s709_s27, %s818_s3 }
 0x22f   :  { %p715_p3 = pnand %p713_p2, %p710_p1 }
 0x231   :  { %718 = shalt.err (!%p715_p3)
}
 0x232   :  { %445 = dma.vmem_to_hbm [thread:$0]  %s440_s23, 256, %s818_s3, [#allocation5], %s729_s1, %s729_s1, %s730_s9  }
 0x233   :  { %723 = dma.done.wait [#allocation5], 256  }
 0x234   :  { %724 = vsyncadd [#allocation5], 4294967040 }
 0x235   :  { %449 = vsyncpa [#allocation4], 1 }
 0x236   :  { %450 = vsyncpa [#allocation7], 1 }
 0x237   :  { %451 = vsyncpa [#allocation5], 1 }

</bundles_post_ra>
